<compile_context>
chip_gen: v7x
topology: tpu7x:2x2x1
jax: 0.10.0
libtpu: 0.0.40
codegen_flags: <defaults>
</compile_context>

<pallas_src>
import jax
import jax.numpy as jnp
from jax import lax
from jax.experimental import pallas as pl
from jax.experimental.pallas import tpu as pltpu

HIDDEN = 64


def _round_up(x, m):
    return (x + m - 1) // m * m


def _critic_kernel(x_ref, w1_ref, w2_ref, w3_ref, b12_ref, b3_ref, o_ref):
    # x_ref:   (TILE_B, S)  f32
    # w1_ref:  (S, 64)      bf16  (VMEM-resident across grid steps)
    # w2_ref:  (64, 64)     bf16  (resident)
    # w3_ref:  (1, 64)      f32   (resident)  == value.weight as a row
    # b12_ref: (1, 128)     f32   (resident)  == [b1 | b2]
    # b3_ref:  (1, 1)       f32   SMEM scalar == value.bias
    # o_ref:   (1, TILE_B)  f32   lane-dense values for this batch tile
    b1 = b12_ref[:, :HIDDEN]
    b2 = b12_ref[:, HIDDEN:]

    x = x_ref[...].astype(jnp.bfloat16)
    h1 = jnp.tanh(
        jnp.dot(x, w1_ref[...], preferred_element_type=jnp.float32) + b1)
    h2 = jnp.tanh(
        jnp.dot(h1.astype(jnp.bfloat16), w2_ref[...],
                preferred_element_type=jnp.float32) + b2)

    # Value head as "A . B^T": contract the hidden dim of both operands so the
    # result is already (1, TILE_B) with batch on the lane axis (unmasked vst),
    # instead of an N=1 MXU matmul + masked [TILE_B, 1] store.
    v = lax.dot_general(
        w3_ref[...], h2,
        dimension_numbers=(((1,), (1,)), ((), ())),
        preferred_element_type=jnp.float32)                     # (1, TILE_B)
    o_ref[...] = (v + b3_ref[0, 0]).astype(o_ref.dtype)


def critic_forward(x, params, *, tile_b=None):
    """x: [B, n_states] f32. params: dict of (w1,b1,w2,b2,w3,b3). Returns [B, 1] f32."""
    B, S = x.shape
    if tile_b is None:
        # >=128 so the MXU M dim is filled (v5e), multiple of 8, capped at 512.
        tile_b = min(512, _round_up(max(B, 1), 128))
    tile_b = max(128, _round_up(tile_b, 8))
    b_pad = _round_up(B, tile_b)
    num_tiles = b_pad // tile_b
    if b_pad != B:
        x = jnp.pad(x, ((0, b_pad - B), (0, 0)))

    # Weights stored [in, out]; hidden-layer weights fed to the MXU as bf16.
    w1 = params["w1"].astype(jnp.bfloat16)                      # (S, 64)
    w2 = params["w2"].astype(jnp.bfloat16)                      # (64, 64)
    w3 = params["w3"].reshape(1, HIDDEN).astype(jnp.float32)    # (1, 64)
    b12 = jnp.concatenate(
        [params["b1"], params["b2"]], axis=1).astype(jnp.float32)   # (1, 128)
    b3 = params["b3"].reshape(1, 1).astype(jnp.float32)         # (1, 1) -> SMEM

    cost = pl.CostEstimate(
        flops=2 * b_pad * (S * HIDDEN + HIDDEN * HIDDEN + HIDDEN),
        transcendentals=2 * b_pad * HIDDEN,
        bytes_accessed=(b_pad * S * 4 + w1.size * 2 + w2.size * 2
                        + w3.size * 4 + b12.size * 4 + 4 + b_pad * 4),
    )

    out = pl.pallas_call(
        _critic_kernel,
        out_shape=jax.ShapeDtypeStruct((1, b_pad), jnp.float32),
        grid=(num_tiles,),
        in_specs=[
            pl.BlockSpec((tile_b, S), lambda i: (i, 0)),        # x: streamed
            pl.BlockSpec((S, HIDDEN), lambda i: (0, 0)),        # w1: resident
            pl.BlockSpec((HIDDEN, HIDDEN), lambda i: (0, 0)),   # w2: resident
            pl.BlockSpec((1, HIDDEN), lambda i: (0, 0)),        # w3 row: resident
            pl.BlockSpec((1, 2 * HIDDEN), lambda i: (0, 0)),    # [b1|b2]: resident
            pl.BlockSpec(memory_space=pltpu.MemorySpace.SMEM),  # b3 scalar
        ],
        out_specs=pl.BlockSpec((1, tile_b), lambda i: (0, i)),  # lane-dense
        compiler_params=pltpu.CompilerParams(
            dimension_semantics=("parallel",)),
        cost_estimate=cost,
    )(x, w1, w2, w3, b12, b3)

    return out[0, :B].reshape(B, 1)


def init_params(key, n_states, hidden=HIDDEN):
    """Deterministic init mimicking PyTorch Linear's U(-1/sqrt(fan_in), 1/sqrt(fan_in))."""
    ks = jax.random.split(key, 6)

    def linear(kw, kb, fan_in, fan_out):
        bound = 1.0 / jnp.sqrt(fan_in)
        w = jax.random.uniform(kw, (fan_in, fan_out), jnp.float32, -bound, bound)
        b = jax.random.uniform(kb, (1, fan_out), jnp.float32, -bound, bound)
        return w, b

    w1, b1 = linear(ks[0], ks[1], n_states, hidden)
    w2, b2 = linear(ks[2], ks[3], hidden, hidden)
    w3, b3 = linear(ks[4], ks[5], hidden, 1)
    return {"w1": w1, "b1": b1, "w2": w2, "b2": b2, "w3": w3, "b3": b3}


def critic_ref_f32(x, p):
    """Pure f32 reference (matches the PyTorch module's math)."""
    h1 = jnp.tanh(x @ p["w1"] + p["b1"])
    h2 = jnp.tanh(h1 @ p["w2"] + p["b2"])
    return h2 @ p["w3"] + p["b3"]


def critic_ref_bf16(x, p):
    """Reference mirroring the kernel's bf16-MXU / f32-accumulate math."""
    bf = jnp.bfloat16
    h1 = jnp.tanh(
        jnp.dot(x.astype(bf), p["w1"].astype(bf),
                preferred_element_type=jnp.float32) + p["b1"])
    h2 = jnp.tanh(
        jnp.dot(h1.astype(bf), p["w2"].astype(bf),
                preferred_element_type=jnp.float32) + p["b2"])
    return jnp.dot(h2, p["w3"], preferred_element_type=jnp.float32) + p["b3"]


if __name__ == "__main__":
    key = jax.random.PRNGKey(0)
    k_x, k_p = jax.random.split(key)

    n_states = 32
    batch = 8
    x = jax.random.normal(k_x, (batch, n_states), jnp.float32)
    params = init_params(k_p, n_states)

    out = jax.block_until_ready(critic_forward(x, params))
    assert out.shape == (batch, 1)

    ref_exact = critic_ref_bf16(x, params)   # same precision path as the kernel
    ref_f32 = critic_ref_f32(x, params)      # module-semantics sanity check
    assert jnp.allclose(out, ref_exact, atol=2e-3, rtol=2e-3)
    assert jnp.allclose(out, ref_f32, atol=5e-2, rtol=5e-2)

    print("KERNEL_OK")
</pallas_src>

<mosaic_0001>
module attributes {stable_mosaic.version = 11 : i64} {
  func.func @_critic_kernel(%arg0: i32, %arg1: memref<128x32xf32, #tpu.memory_space<vmem>>, %arg2: memref<32x64xbf16, #tpu.memory_space<vmem>>, %arg3: memref<64x64xbf16, #tpu.memory_space<vmem>>, %arg4: memref<1x64xf32, #tpu.memory_space<vmem>>, %arg5: memref<1x128xf32, #tpu.memory_space<vmem>>, %arg6: memref<1x1xf32, #tpu.memory_space<smem>>, %arg7: memref<1x128xf32, #tpu.memory_space<vmem>>) attributes {dimension_semantics = [#tpu.dimension_semantics<parallel>], iteration_bounds = array<i64: 1>, scalar_prefetch = 0 : i64, scratch_operands = 0 : i64, tpu.core_type = #tpu.core_type<tc>, window_params = [{transform_indices = @transform_0, window_bounds = array<i64: 128, 32>}, {pipeline_mode = #tpu.pipeline_mode<synchronous>, transform_indices = @transform_1, window_bounds = array<i64: 32, 64>}, {pipeline_mode = #tpu.pipeline_mode<synchronous>, transform_indices = @transform_2, window_bounds = array<i64: 64, 64>}, {pipeline_mode = #tpu.pipeline_mode<synchronous>, transform_indices = @transform_3, window_bounds = array<i64: 1, 64>}, {pipeline_mode = #tpu.pipeline_mode<synchronous>, transform_indices = @transform_4, window_bounds = array<i64: 1, 128>}, {transform_indices = @transform_5, window_bounds = array<i64: 1, 1>}, {transform_indices = @transform_6, window_bounds = array<i64: 1, 128>}]} {
    %c0 = arith.constant 0 : index
    %c0_0 = arith.constant 0 : index
    %0 = vector.load %arg5[%c0, %c0_0] : memref<1x128xf32, #tpu.memory_space<vmem>>, vector<1x64xf32>
    %c0_1 = arith.constant 0 : index
    %c64 = arith.constant 64 : index
    %1 = vector.load %arg5[%c0_1, %c64] : memref<1x128xf32, #tpu.memory_space<vmem>>, vector<1x64xf32>
    %c0_2 = arith.constant 0 : index
    %c0_3 = arith.constant 0 : index
    %2 = vector.load %arg1[%c0_2, %c0_3] : memref<128x32xf32, #tpu.memory_space<vmem>>, vector<128x32xf32>
    %3 = arith.truncf %2 : vector<128x32xf32> to vector<128x32xbf16>
    %c0_4 = arith.constant 0 : index
    %c0_5 = arith.constant 0 : index
    %4 = vector.load %arg2[%c0_4, %c0_5] : memref<32x64xbf16, #tpu.memory_space<vmem>>, vector<32x64xbf16>
    %cst = arith.constant dense<0.000000e+00> : vector<128x64xf32>
    %5 = tpu.matmul %3, %4, %cst {dimension_numbers = #tpu.dot_dimension_numbers<[1], [0], [0], [1], [0, 0, 1, 1], [], []>} : vector<128x32xbf16>, vector<32x64xbf16>, vector<128x64xf32> -> vector<128x64xf32>
    %6 = vector.broadcast %0 : vector<1x64xf32> to vector<128x64xf32>
    %7 = arith.addf %5, %6 : vector<128x64xf32>
    %8 = math.tanh %7 : vector<128x64xf32>
    %9 = arith.truncf %8 : vector<128x64xf32> to vector<128x64xbf16>
    %c0_6 = arith.constant 0 : index
    %c0_7 = arith.constant 0 : index
    %10 = vector.load %arg3[%c0_6, %c0_7] : memref<64x64xbf16, #tpu.memory_space<vmem>>, vector<64x64xbf16>
    %cst_8 = arith.constant dense<0.000000e+00> : vector<128x64xf32>
    %11 = tpu.matmul %9, %10, %cst_8 {dimension_numbers = #tpu.dot_dimension_numbers<[1], [0], [0], [1], [0, 0, 1, 1], [], []>} : vector<128x64xbf16>, vector<64x64xbf16>, vector<128x64xf32> -> vector<128x64xf32>
    %12 = vector.broadcast %1 : vector<1x64xf32> to vector<128x64xf32>
    %13 = arith.addf %11, %12 : vector<128x64xf32>
    %14 = math.tanh %13 : vector<128x64xf32>
    %c0_9 = arith.constant 0 : index
    %c0_10 = arith.constant 0 : index
    %15 = vector.load %arg4[%c0_9, %c0_10] : memref<1x64xf32, #tpu.memory_space<vmem>>, vector<1x64xf32>
    %cst_11 = arith.constant dense<0.000000e+00> : vector<1x128xf32>
    %16 = tpu.matmul %15, %14, %cst_11 {dimension_numbers = #tpu.dot_dimension_numbers<[1], [1], [0], [0], [0, 0, 1, 0], [], []>} : vector<1x64xf32>, vector<128x64xf32>, vector<1x128xf32> -> vector<1x128xf32>
    %c0_12 = arith.constant 0 : index
    %c0_13 = arith.constant 0 : index
    %17 = memref.load %arg6[%c0_12, %c0_13] : memref<1x1xf32, #tpu.memory_space<smem>>
    %18 = vector.broadcast %17 : f32 to vector<1x128xf32>
    %19 = arith.addf %16, %18 : vector<1x128xf32>
    %c0_14 = arith.constant 0 : index
    %c0_15 = arith.constant 0 : index
    %20 = vector.load %arg7[%c0_14, %c0_15] : memref<1x128xf32, #tpu.memory_space<vmem>>, vector<1x128xf32>
    tpu.vector_store %arg7[%c0_14, %c0_15], %19 {strides = array<i32>} : memref<1x128xf32, #tpu.memory_space<vmem>>, vector<1x128xf32>,
    return
  }
  func.func @transform_0(%arg0: i32) -> (i32, i32) {
    %c0_i32 = arith.constant 0 : i32
    %c0_i32_0 = arith.constant 0 : i32
    return %arg0, %c0_i32 : i32, i32
  }
  func.func @transform_1(%arg0: i32) -> (i32, i32) {
    %c0_i32 = arith.constant 0 : i32
    %c0_i32_0 = arith.constant 0 : i32
    %c0_i32_1 = arith.constant 0 : i32
    return %c0_i32, %c0_i32_0 : i32, i32
  }
  func.func @transform_2(%arg0: i32) -> (i32, i32) {
    %c0_i32 = arith.constant 0 : i32
    %c0_i32_0 = arith.constant 0 : i32
    %c0_i32_1 = arith.constant 0 : i32
    return %c0_i32, %c0_i32_0 : i32, i32
  }
  func.func @transform_3(%arg0: i32) -> (i32, i32) {
    %c0_i32 = arith.constant 0 : i32
    %c0_i32_0 = arith.constant 0 : i32
    %c0_i32_1 = arith.constant 0 : i32
    return %c0_i32, %c0_i32_0 : i32, i32
  }
  func.func @transform_4(%arg0: i32) -> (i32, i32) {
    %c0_i32 = arith.constant 0 : i32
    %c0_i32_0 = arith.constant 0 : i32
    %c0_i32_1 = arith.constant 0 : i32
    return %c0_i32, %c0_i32_0 : i32, i32
  }
  func.func @transform_5(%arg0: i32) -> (i32, i32) {
    %c0_i32 = arith.constant 0 : i32
    %c0_i32_0 = arith.constant 0 : i32
    %c0_i32_1 = arith.constant 0 : i32
    return %c0_i32, %c0_i32_0 : i32, i32
  }
  func.func @transform_6(%arg0: i32) -> (i32, i32) {
    %c0_i32 = arith.constant 0 : i32
    %c0_i32_0 = arith.constant 0 : i32
    return %c0_i32, %arg0 : i32, i32
  }
}

</mosaic_0001>

<bundles_post_ra>
// kernel: tpu_custom_call.1
= control target key start
LH: loop header
LB: loop body
LE: loop exit
PB: predicated region body
PF: predicated region fallthrough
CT: control target
= control target key end

     0   :  { %vm73_vm0 = vcmask 261120   ;;  %s1013_s0 = inlined_call_operand.vmem [shape: f32[128,32], index: 0, kind: input, shape index: {}]   ;;  %s1014_s1 = inlined_call_operand.vmem [shape: bf16[32,64], index: 1, kind: input, shape index: {}]   ;;  %s1015_s2 = inlined_call_operand.vmem [shape: bf16[64,64], index: 2, kind: input, shape index: {}]   ;;  %s1016_s3 = inlined_call_operand.vmem [shape: f32[1,64], index: 3, kind: input, shape index: {}]   ;;  %s1017_s4 = inlined_call_operand.vmem [shape: f32[1,128], index: 4, kind: input, shape index: {}]   ;;  %s1018_s5 = inlined_call_operand.<no memory space> [shape: f32[1,1], index: 5, kind: input, shape index: {}]   ;;  %s1019_s6 = inlined_call_operand.hbm [shape: f32[1,128], index: 6, kind: output, shape index: {}]  }
   0x1   :  { %v726_v0 = vld [vmem:[%s1014_s1] sm:$0xff]   ;;  %v727_v1 = vld [vmem:[%s1014_s1 + $0x8] sm:$0xff]   ;;  %v29_v5 = vld [vmem:[%s1013_s0 + $0x10] sm:$0xff] }
   0x2   :  { %610 = vmatprep.subr.bf16.mxu1 %v726_v0  ;;  %v27_v2 = vld [vmem:[%s1013_s0] sm:$0xff]  ;;  %v28_v3 = vld [vmem:[%s1013_s0 + $0x8] sm:$0xff]  ;;  %v30_v6 = vld [vmem:[%s1013_s0 + $0x18] sm:$0xff] }
   0x3   :  { %611 = vmatpush3.bf16.msra.mxu1 %v726_v0  ;;  %v43_v4 = vpack.c.bf16 %v28_v3, %v27_v2  ;;  %v31_v7 = vld [vmem:[%s1013_s0 + $0x20] sm:$0xff]  ;;  %v32_v8 = vld [vmem:[%s1013_s0 + $0x28] sm:$0xff]  ;;  %v44_v9 = vpack.c.bf16 %v30_v6, %v29_v5 }
   0x4   :  { %612 = vmatprep.subr.bf16.mxu1 %v727_v1  ;;  %v45_v10 = vpack.c.bf16 %v32_v8, %v31_v7  ;;  %v728_v11 = vld [vmem:[%s1015_s2] sm:$0xff]   ;;  %v729_v12 = vld [vmem:[%s1015_s2 + $0x8] sm:$0xff]  }
   0x5   :  { %614 = vmatprep.mubr.msk.bf16.mxu1 %vm73_vm0, %v43_v4 }
   0x7   :  { %613 = vmatpush3.bf16.msra.mxu1 %v727_v1 }
   0x8   :  { %630 = vmatprep.subr.bf16.mxu1 %v728_v11 }
   0xa   :  { %615 = vmatmul.mubr.msk.bf16.vlgmr.msra.gmra.mrb[0].mxu1 %vm73_vm0, %v44_v9 }
   0xb   :  { %12 = vsyncpa [#allocation4], 0  ;;  %618 = vmatprep.mubr.msk.bf16.mxu1 %vm73_vm0, %v45_v10  ;;  %v33_v13 = vld [vmem:[%s1013_s0 + $0x30] sm:$0xff]  ;;  %v34_v14 = vld [vmem:[%s1013_s0 + $0x38] sm:$0xff]  ;;  %631 = vmatpush3.bf16.msra.mxu1 %v728_v11  ;;  %vm254_vm1 = vcmask 523264   ;;  %vm822_vm2 = vmmov 0  }
   0xc   :  { %v35_v15 = vld [vmem:[%s1013_s0 + $0x40] sm:$0xff]  ;;  %v36_v16 = vld [vmem:[%s1013_s0 + $0x48] sm:$0xff]  ;;  %632 = vmatprep.subr.bf16.mxu1 %v729_v12  ;;  %v46_v17 = vpack.c.bf16 %v34_v14, %v33_v13  ;;  %v37_v19 = vld [vmem:[%s1013_s0 + $0x50] sm:$0xff]  ;;  %s824_s19 = smov [#allocation3]  }
   0xd   :  { %v47_v18 = vpack.c.bf16 %v36_v16, %v35_v15  ;;  %v38_v20 = vld [vmem:[%s1013_s0 + $0x58] sm:$0xff]  ;;  %v39_v21 = vld [vmem:[%s1013_s0 + $0x60] sm:$0xff]  ;;  %v40_v22 = vld [vmem:[%s1013_s0 + $0x68] sm:$0xff]  ;;  %s523_s20 = sshll.u32 %s824_s19, 4  ;;  %s524_s20 = int_to_ptr.vmem [resolvable:$true] %s523_s20 }
   0xe   :  { %v48_v23 = vpack.c.bf16 %v38_v20, %v37_v19  ;;  %v49_v24 = vpack.c.bf16 %v40_v22, %v39_v21  ;;  %v41_v25 = vld [vmem:[%s1013_s0 + $0x70] sm:$0xff]  ;;  %v42_v26 = vld [vmem:[%s1013_s0 + $0x78] sm:$0xff]  ;;  %v937_v30 = vld [vmem:[%s1017_s4] ss:$0 sm:$0xff]  ;;  %s820_s0 = smov 64   ;;  %s796_s21 = scalar_lea.vmem %s524_s20, 16 }
   0xf   :  { %633 = vmatpush3.bf16.msra.mxu1 %v729_v12  ;;  %v50_v27 = vpack.c.bf16 %v42_v26, %v41_v25  ;;  %v730_v28 = vld [vmem:[%s1015_s2 + $0x10] sm:$0xff]   ;;  %v731_v29 = vld [vmem:[%s1015_s2 + $0x18] sm:$0xff]   ;;  %251 = vrot.lane.b32.xlu0 %v937_v30, %s820_s0  ;;  %vm967_vm3 = vmpackc.low %vm254_vm1, %vm254_vm1  ;;  %p797_p0 = scmp.ne.s32.totalorder %s524_s20, %s796_s21  ;;  %s800_s22 = scalar_lea.vmem %s524_s20, 32 }
  0x10   :  { %634 = vmatprep.subr.bf16.mxu1 %v730_v28  ;;  %p801_p1 = scmp.lt.s32.totalorder %s524_s20, %s524_s20  ;;  %p802_p2 = scmp.lt.s32.totalorder %s800_s22, %s796_s21 }
  0x12   :  { %619 = vmatmul.mubr.msk.bf16.gmra.mrb[4].mxu1 %vm73_vm0, %v46_v17  ;;  %p803_p3 = por %p802_p2, %p801_p1 }
  0x13   :  { %622 = vmatprep.mubr.msk.bf16.mxu1 %vm73_vm0, %v47_v18  ;;  %635 = vmatpush3.bf16.msra.mxu1 %v730_v28 }
  0x14   :  { %636 = vmatprep.subr.bf16.mxu1 %v731_v29  ;;  %p804_p4 = pnand %p803_p3, %p797_p0 }
  0x17   :  { %637 = vmatpush3.bf16.msra.mxu1 %v731_v29 }
  0x1a   :  { %623 = vmatmul.mubr.msk.bf16.gmra.mrb[8].mxu1 %vm73_vm0, %v48_v23  ;;  %v821_v23 = vmov 0.0|0.0  }
  0x1b   :  { %626 = vmatprep.mubr.msk.bf16.mxu1 %vm73_vm0, %v49_v24  ;;  %689 = vmatprep.subr.bf16.mxu0 %v821_v23  ;;  %v823_v24 = vmov 0.0  }
  0x1c   :  { %686 = vmatprep.mubr.msk.f32.mxu0 %vm822_vm2, %v823_v24 }
  0x22   :  { %627 = vmatmul.mubr.msk.bf16.gmra.mrb[12].mxu1 %vm73_vm0, %v50_v27 }
  0x81   :  { %v252_v25 = vpop.permute.xlu0 %251 }
  0xdd   :  { %v616_v31 = vpop.f32.mrb[0].mxu1 }
  0xde   :  { %v141_v32 = vadd.f32 %v616_v31, %v937_v30  ;;  %v132_v33 = vpop.f32.mrb[1].mxu1 }
  0xdf   :  { %v133_v34 = vadd.f32 %v937_v30, %v132_v33  ;;  %v617_v35 = vpop.f32.mrb[2].mxu1 }
  0xe0   :  { %732 = vtanh.f32 %v141_v32  ;;  %v144_v36 = vadd.f32 %v617_v35, %v937_v30  ;;  %v135_v37 = vpop.f32.mrb[3].mxu1 }
  0xe1   :  { %734 = vtanh.f32 %v133_v34  ;;  %v136_v38 = vadd.f32 %v937_v30, %v135_v37 }
  0xe2   :  { %736 = vtanh.f32 %v144_v36 }
  0xe3   :  { %738 = vtanh.f32 %v136_v38 }
  0xe5   :  { %v620_v39 = vpop.f32.mrb[4].mxu1 }
  0xe6   :  { %v157_v40 = vadd.f32 %v620_v39, %v937_v30  ;;  %v148_v41 = vpop.f32.mrb[5].mxu1 }
  0xe7   :  { %v149_v42 = vadd.f32 %v937_v30, %v148_v41  ;;  %v621_v43 = vpop.f32.mrb[6].mxu1 }
  0xe8   :  { %740 = vtanh.f32 %v157_v40  ;;  %v160_v44 = vadd.f32 %v621_v43, %v937_v30  ;;  %v151_v45 = vpop.f32.mrb[7].mxu1 }
  0xe9   :  { %742 = vtanh.f32 %v149_v42  ;;  %v152_v46 = vadd.f32 %v937_v30, %v151_v45 }
  0xea   :  { %v733_v47 = vpop.eup %732  ;;  %744 = vtanh.f32 %v160_v44 }
  0xeb   :  { %v735_v48 = vpop.eup %734  ;;  %746 = vtanh.f32 %v152_v46 }
  0xec   :  { %v737_v49 = vpop.eup %736 }
  0xed   :  { %v739_v50 = vpop.eup %738  ;;  %v212_v51 = vpack.c.bf16 %v737_v49, %v733_v47  ;;  %v624_v52 = vpop.f32.mrb[8].mxu1 }
  0xee   :  { %v173_v53 = vadd.f32 %v624_v52, %v937_v30  ;;  %v164_v54 = vpop.f32.mrb[9].mxu1  ;;  %v211_v55 = vpack.c.bf16 %v739_v50, %v735_v48 }
  0xef   :  { %v165_v56 = vadd.f32 %v937_v30, %v164_v54  ;;  %v625_v57 = vpop.f32.mrb[10].mxu1 }
  0xf0   :  { %748 = vtanh.f32 %v173_v53  ;;  %v176_v58 = vadd.f32 %v625_v57, %v937_v30  ;;  %v167_v59 = vpop.f32.mrb[11].mxu1  ;;  %638 = vmatprep.mubr.msk.bf16.mxu1 %vm254_vm1, %v211_v55 }
  0xf1   :  { %750 = vtanh.f32 %v165_v56  ;;  %v168_v60 = vadd.f32 %v937_v30, %v167_v59  ;;  %639 = vmatmul.mubr.msk.bf16.vlgmr.msra.gmra.mrb[16].mxu1 %vm254_vm1, %v212_v51 }
  0xf2   :  { %v741_v61 = vpop.eup %740  ;;  %752 = vtanh.f32 %v176_v58 }
  0xf3   :  { %v743_v62 = vpop.eup %742  ;;  %754 = vtanh.f32 %v168_v60 }
  0xf4   :  { %v745_v63 = vpop.eup %744 }
  0xf5   :  { %v747_v0 = vpop.eup %746  ;;  %v628_v1 = vpop.f32.mrb[12].mxu1  ;;  %v214_v2 = vpack.c.bf16 %v745_v63, %v741_v61 }
  0xf6   :  { %v189_v3 = vadd.f32 %v628_v1, %v937_v30  ;;  %v180_v4 = vpop.f32.mrb[13].mxu1  ;;  %v213_v5 = vpack.c.bf16 %v747_v0, %v743_v62 }
  0xf7   :  { %v181_v6 = vadd.f32 %v937_v30, %v180_v4  ;;  %v629_v7 = vpop.f32.mrb[14].mxu1 }
  0xf8   :  { %756 = vtanh.f32 %v189_v3  ;;  %v192_v8 = vadd.f32 %v629_v7, %v937_v30  ;;  %v183_v9 = vpop.f32.mrb[15].mxu1  ;;  %642 = vmatprep.mubr.msk.bf16.mxu1 %vm254_vm1, %v213_v5 }
  0xf9   :  { %758 = vtanh.f32 %v181_v6  ;;  %v184_v10 = vadd.f32 %v937_v30, %v183_v9  ;;  %643 = vmatmul.mubr.msk.bf16.gmra.mrb[20].mxu1 %vm254_vm1, %v214_v2 }
  0xfa   :  { %v749_v11 = vpop.eup %748  ;;  %760 = vtanh.f32 %v192_v8 }
  0xfb   :  { %v751_v12 = vpop.eup %750  ;;  %762 = vtanh.f32 %v184_v10 }
  0xfc   :  { %v753_v13 = vpop.eup %752 }
  0xfd   :  { %v755_v14 = vpop.eup %754  ;;  %v216_v15 = vpack.c.bf16 %v753_v13, %v749_v11 }
  0xfe   :  { %v215_v16 = vpack.c.bf16 %v755_v14, %v751_v12 }
 0x100   :  { %646 = vmatprep.mubr.msk.bf16.mxu1 %vm254_vm1, %v215_v16 }
 0x101   :  { %647 = vmatmul.mubr.msk.bf16.gmra.mrb[24].mxu1 %vm254_vm1, %v216_v15 }
 0x102   :  { %v757_v17 = vpop.eup %756 }
 0x103   :  { %v759_v18 = vpop.eup %758 }
 0x104   :  { %v761_v19 = vpop.eup %760 }
 0x105   :  { %v763_v20 = vpop.eup %762  ;;  %v218_v21 = vpack.c.bf16 %v761_v19, %v757_v17  ;;  %v392_v19 = vld [vmem:[%s1016_s3] sm:$0x1] }
 0x106   :  { %v217_v22 = vpack.c.bf16 %v763_v20, %v759_v18  ;;  %v394_v20 = vstv %s1018_s5 }
 0x108   :  { %650 = vmatprep.mubr.msk.bf16.mxu1 %vm254_vm1, %v217_v22 }
 0x109   :  { %651 = vmatmul.mubr.msk.bf16.gmra.mrb[28].mxu1 %vm254_vm1, %v218_v21 }
 0x1c4   :  { %v640_v26 = vpop.f32.mrb[16].mxu1 }
 0x1c5   :  { %v322_v27 = vadd.f32 %v640_v26, %v252_v25  ;;  %v313_v28 = vpop.f32.mrb[17].mxu1 }
 0x1c6   :  { %v314_v29 = vadd.f32 %v313_v28, %v252_v25  ;;  %v641_v30 = vpop.f32.mrb[18].mxu1 }
 0x1c7   :  { %764 = vtanh.f32 %v322_v27  ;;  %v325_v31 = vadd.f32 %v641_v30, %v252_v25  ;;  %v316_v32 = vpop.f32.mrb[19].mxu1 }
 0x1c8   :  { %766 = vtanh.f32 %v314_v29  ;;  %v317_v33 = vadd.f32 %v316_v32, %v252_v25 }
 0x1c9   :  { %768 = vtanh.f32 %v325_v31 }
 0x1ca   :  { %770 = vtanh.f32 %v317_v33 }
 0x1cc   :  { %v644_v34 = vpop.f32.mrb[20].mxu1 }
 0x1cd   :  { %v338_v35 = vadd.f32 %v644_v34, %v252_v25  ;;  %v329_v36 = vpop.f32.mrb[21].mxu1 }
 0x1ce   :  { %v330_v37 = vadd.f32 %v329_v36, %v252_v25  ;;  %v645_v38 = vpop.f32.mrb[22].mxu1 }
 0x1cf   :  { %772 = vtanh.f32 %v338_v35  ;;  %v341_v39 = vadd.f32 %v645_v38, %v252_v25  ;;  %v332_v40 = vpop.f32.mrb[23].mxu1 }
 0x1d0   :  { %774 = vtanh.f32 %v330_v37  ;;  %v333_v41 = vadd.f32 %v332_v40, %v252_v25 }
 0x1d1   :  { %v765_v42 = vpop.eup %764  ;;  %776 = vtanh.f32 %v341_v39 }
 0x1d2   :  { %v767_v43 = vpop.eup %766  ;;  %778 = vtanh.f32 %v333_v41 }
 0x1d3   :  { %v769_v44 = vpop.eup %768 }
 0x1d4   :  { %v771_v45 = vpop.eup %770  ;;  %v648_v46 = vpop.f32.mrb[24].mxu1  ;;  %v694_v48 = vpack.c.bf16 %v769_v44, %v765_v42 }
 0x1d5   :  { %v354_v49 = vadd.f32 %v648_v46, %v252_v25  ;;  %v345_v50 = vpop.f32.mrb[25].mxu1  ;;  %v690_v51 = vpack.c.bf16 %v771_v45, %v767_v43 }
 0x1d6   :  { %v346_v52 = vadd.f32 %v345_v50, %v252_v25  ;;  %v649_v53 = vpop.f32.mrb[26].mxu1 }
 0x1d7   :  { %780 = vtanh.f32 %v354_v49  ;;  %v357_v54 = vadd.f32 %v649_v53, %v252_v25  ;;  %v348_v55 = vpop.f32.mrb[27].mxu1  ;;  %692 = vmatpush3.bf16.xpose.msk.msra.mxu0 %vm967_vm3, %v690_v51 }
 0x1d8   :  { %782 = vtanh.f32 %v346_v52  ;;  %v349_v56 = vadd.f32 %v348_v55, %v252_v25  ;;  %693 = vmatprep.subr.bf16.mxu0 %v821_v23 }
 0x1d9   :  { %v773_v57 = vpop.eup %772  ;;  %784 = vtanh.f32 %v357_v54 }
 0x1da   :  { %v775_v58 = vpop.eup %774  ;;  %786 = vtanh.f32 %v349_v56 }
 0x1db   :  { %v777_v59 = vpop.eup %776 }
 0x1dc   :  { %v779_v60 = vpop.eup %778  ;;  %v652_v61 = vpop.f32.mrb[28].mxu1  ;;  %v702_v62 = vpack.c.bf16 %v777_v59, %v773_v57 }
 0x1dd   :  { %v370_v63 = vadd.f32 %v652_v61, %v252_v25  ;;  %v361_v0 = vpop.f32.mrb[29].mxu1  ;;  %v698_v1 = vpack.c.bf16 %v779_v60, %v775_v58 }
 0x1de   :  { %v362_v2 = vadd.f32 %v361_v0, %v252_v25  ;;  %v653_v3 = vpop.f32.mrb[30].mxu1 }
 0x1df   :  { %788 = vtanh.f32 %v370_v63  ;;  %v373_v4 = vadd.f32 %v653_v3, %v252_v25  ;;  %v364_v5 = vpop.f32.mrb[31].mxu1  ;;  %696 = vmatpush3.bf16.xpose.msk.msra.mxu0 %vm967_vm3, %v694_v48 }
 0x1e0   :  { %790 = vtanh.f32 %v362_v2  ;;  %v365_v6 = vadd.f32 %v364_v5, %v252_v25  ;;  %697 = vmatprep.subr.bf16.mxu0 %v821_v23 }
 0x1e1   :  { %v781_v7 = vpop.eup %780  ;;  %792 = vtanh.f32 %v373_v4 }
 0x1e2   :  { %v783_v8 = vpop.eup %782  ;;  %794 = vtanh.f32 %v365_v6 }
 0x1e3   :  { %v785_v9 = vpop.eup %784 }
 0x1e4   :  { %v787_v10 = vpop.eup %786  ;;  %v710_v11 = vpack.c.bf16 %v785_v9, %v781_v7 }
 0x1e5   :  { %v706_v12 = vpack.c.bf16 %v787_v10, %v783_v8 }
 0x1e7   :  { %700 = vmatpush3.bf16.xpose.msk.msra.mxu0 %vm967_vm3, %v698_v1 }
 0x1e8   :  { %701 = vmatprep.subr.bf16.mxu0 %v821_v23 }
 0x1e9   :  { %v789_v13 = vpop.eup %788 }
 0x1ea   :  { %v791_v14 = vpop.eup %790 }
 0x1eb   :  { %v793_v15 = vpop.eup %792 }
 0x1ec   :  { %v795_v16 = vpop.eup %794  ;;  %v718_v17 = vpack.c.bf16 %v793_v15, %v789_v13 }
 0x1ed   :  { %v714_v18 = vpack.c.bf16 %v795_v16, %v791_v14 }
 0x1ef   :  { %704 = vmatpush3.bf16.xpose.msk.msra.mxu0 %vm967_vm3, %v702_v62 }
 0x1f0   :  { %705 = vmatprep.subr.bf16.mxu0 %v821_v23 }
 0x1f7   :  { %708 = vmatpush3.bf16.xpose.msk.msra.mxu0 %vm967_vm3, %v706_v12 }
 0x1f8   :  { %709 = vmatprep.subr.bf16.mxu0 %v821_v23 }
 0x1ff   :  { %712 = vmatpush3.bf16.xpose.msk.msra.mxu0 %vm967_vm3, %v710_v11 }
 0x200   :  { %713 = vmatprep.subr.bf16.mxu0 %v821_v23 }
 0x207   :  { %716 = vmatpush3.bf16.xpose.msk.msra.mxu0 %vm967_vm3, %v714_v18 }
 0x208   :  { %717 = vmatprep.subr.bf16.mxu0 %v821_v23 }
 0x20f   :  { %720 = vmatpush3.bf16.xpose.msk.msra.mxu0 %vm967_vm3, %v718_v17 }
 0x216   :  { %687 = vmatmul.mubr.msk.f32.vlgmr.msra.gmra.mrb[0].mxu0 %vm254_vm1, %v392_v19 }
 0x2e9   :  { %v512_v21 = vpop.f32.mrb[0].mxu0 }
 0x2ea   :  { %v513_v22 = vadd.f32 %v512_v21, %v394_v20  ;;  %v688_v24 = vpop.f32.mrb[1].mxu0 }
 0x2ec   :  { %516 = vst [vmem:[#allocation3] sm:$0x1] %v513_v22 }
 0x2ed   :  { %807 = shalt.err (!%p804_p4)
}
 0x2ee   :  { %s808_s24 = scalar_lea.hbm %s1019_s6, 16 }
 0x2ef   :  { %p809_p5 = scmp.ne.s32.totalorder %s1019_s6, %s808_s24  ;;  %p812_p6 = scmp.lt.u32.totalorder %s808_s24, %s1019_s6 }
 0x2f1   :  { %p814_p7 = pnand %p812_p6, %p809_p5 }
 0x2f3   :  { %817 = shalt.err (!%p814_p7)
}
 0x2f4   :  { %526 = dma.vmem_to_hbm [thread:$0]  %s524_s20, 16, %s1019_s6, [#allocation4]  }
 0x2f5   :  { %818 = dma.done.wait [#allocation4], 16  }
 0x2f6   :  { %819 = vsyncadd [#allocation4], 4294967280 }
 0x2f7   :  { %530 = vsyncpa [#allocation4], 1 }

</bundles_post_ra>
